<compile_context>
chip_gen: v6e
topology: v6e:2x2x1
jax: 0.10.0
libtpu: 0.0.40
codegen_flags: <defaults>
</compile_context>

<pallas_src>
import functools

import jax
import jax.numpy as jnp
from jax.experimental import pallas as pl
from jax.experimental.pallas import tpu as pltpu


def _round_up(x: int, m: int) -> int:
    return (x + m - 1) // m * m


def dense_kernel(x_ref, w_ref, b_ref, out_ref, *, n_mu):
    x = x_ref[...]                                   # [tb, Fin]
    y = jnp.dot(x, w_ref[...], preferred_element_type=jnp.float32) + b_ref[...]
    # Stable softplus (matches F.softplus, beta=1): max(y,0) + log(1 + exp(-|y|)).
    sp = jnp.maximum(y, 0.0) + jnp.log(1.0 + jnp.exp(-jnp.abs(y)))
    # Columns [0, n_mu) are the mu head (identity); columns [n_mu, ...) are sigma
    # (softplus). Selecting via an iota mask keeps one fused, lane-dense 128-wide store.
    col = jax.lax.broadcasted_iota(jnp.int32, y.shape, dimension=1)
    out_ref[...] = jnp.where(col < n_mu, y, sp).astype(out_ref.dtype)


def prepare_params(params):
    """One-time weight prep (hoisted out of the forward path).

    Concatenates the two heads along the output axis and pads that axis to a
    multiple of 128 lanes. Weights are stored [in_features, out_features].
    """
    Fin, Eout = params["w_mu"].shape
    Nout = 2 * Eout
    Nout_p = _round_up(Nout, 128)
    w = jnp.concatenate([params["w_mu"], params["w_sigma"]], axis=1)
    b = jnp.concatenate([params["b_mu"], params["b_sigma"]], axis=1)
    w = jnp.pad(w, ((0, 0), (0, Nout_p - Nout)))
    b = jnp.pad(b, ((0, 0), (0, Nout_p - Nout)))
    return {"w": w, "b": b, "encoded_size": Eout}


def dense_forward(x, prepared, *, block_b: int = 1024):
    """x: [B, input_size] f32. prepared: output of prepare_params."""
    B, Fin = x.shape
    w, b = prepared["w"], prepared["b"]
    Eout = prepared["encoded_size"]
    Nout_p = w.shape[1]

    # Sublane-friendly batch tile; cap so the grid has >=2 steps when B allows it
    # (lets a "parallel" axis shard across both v7x TensorCores).
    B_sub = _round_up(B, 8)
    tb = min(block_b, max(8, _round_up(pl.cdiv(B_sub, 2), 8)))
    B_p = _round_up(B, tb)

    x_p = x if B_p == B else jnp.pad(x, ((0, B_p - B), (0, 0)))

    grid = (B_p // tb,)
    x_spec = pl.BlockSpec((tb, Fin), lambda i: (i, 0))        # last dim == full dim: OK
    w_spec = pl.BlockSpec((Fin, Nout_p), lambda i: (0, 0))    # resident across grid
    b_spec = pl.BlockSpec((1, Nout_p), lambda i: (0, 0))
    o_spec = pl.BlockSpec((tb, Nout_p), lambda i: (i, 0))

    out = pl.pallas_call(
        functools.partial(dense_kernel, n_mu=Eout),
        out_shape=jax.ShapeDtypeStruct((B_p, Nout_p), jnp.float32),
        grid=grid,
        in_specs=[x_spec, w_spec, b_spec],
        out_specs=o_spec,
        compiler_params=pltpu.CompilerParams(
            dimension_semantics=("parallel",),
        ),
    )(x_p, w, b)

    mu = out[:B, :Eout]
    sigma = out[:B, Eout:2 * Eout]
    return mu, sigma


def init_params(key, input_size, encoded_size):
    """Deterministic synthetic parameters; Linear weights stored [in, out]."""
    k1, k2, k3, k4 = jax.random.split(key, 4)
    bound = 1.0 / jnp.sqrt(jnp.float32(input_size))
    return {
        "w_mu": jax.random.uniform(k1, (input_size, encoded_size), jnp.float32, -bound, bound),
        "b_mu": jax.random.uniform(k2, (1, encoded_size), jnp.float32, -bound, bound),
        "w_sigma": jax.random.uniform(k3, (input_size, encoded_size), jnp.float32, -bound, bound),
        "b_sigma": jax.random.uniform(k4, (1, encoded_size), jnp.float32, -bound, bound),
    }


def dense_ref(x, params):
    """Pure-JAX reference mirroring the PyTorch forward."""
    mu = x @ params["w_mu"] + params["b_mu"]
    sigma = jax.nn.softplus(x @ params["w_sigma"] + params["b_sigma"])
    return mu, sigma


if __name__ == "__main__":
    key = jax.random.PRNGKey(0)
    k_params, k_x = jax.random.split(key)

    B = 8
    input_size = 32
    encoded_size = 64

    params = init_params(k_params, input_size, encoded_size)
    prepared = prepare_params(params)          # one-time weight prep, outside forward
    x = jax.random.normal(k_x, (B, input_size), jnp.float32)

    mu, sigma = dense_forward(x, prepared)
    mu = jax.block_until_ready(mu)
    sigma = jax.block_until_ready(sigma)

    mu_ref, sigma_ref = dense_ref(x, params)
    assert mu.shape == (B, encoded_size), mu.shape
    assert sigma.shape == (B, encoded_size), sigma.shape
    assert jnp.allclose(mu, mu_ref, atol=1e-5, rtol=1e-5), float(jnp.max(jnp.abs(mu - mu_ref)))
    assert jnp.allclose(sigma, sigma_ref, atol=1e-5, rtol=1e-5), float(jnp.max(jnp.abs(sigma - sigma_ref)))
    assert jnp.all(sigma >= 0.0)

    print("KERNEL_OK")
</pallas_src>

<mosaic_0001>
module attributes {stable_mosaic.version = 11 : i64} {
  func.func @dense_kernel(%arg0: i32, %arg1: memref<8x32xf32, #tpu.memory_space<vmem>>, %arg2: memref<32x128xf32, #tpu.memory_space<vmem>>, %arg3: memref<1x128xf32, #tpu.memory_space<vmem>>, %arg4: memref<8x128xf32, #tpu.memory_space<vmem>>) attributes {dimension_semantics = [#tpu.dimension_semantics<parallel>], iteration_bounds = array<i64: 1>, scalar_prefetch = 0 : i64, scratch_operands = 0 : i64, tpu.core_type = #tpu.core_type<tc>, window_params = [{transform_indices = @transform_0, window_bounds = array<i64: 8, 32>}, {pipeline_mode = #tpu.pipeline_mode<synchronous>, transform_indices = @transform_1, window_bounds = array<i64: 32, 128>}, {pipeline_mode = #tpu.pipeline_mode<synchronous>, transform_indices = @transform_2, window_bounds = array<i64: 1, 128>}, {transform_indices = @transform_3, window_bounds = array<i64: 8, 128>}]} {
    %c0 = arith.constant 0 : index
    %c0_0 = arith.constant 0 : index
    %0 = vector.load %arg1[%c0, %c0_0] : memref<8x32xf32, #tpu.memory_space<vmem>>, vector<8x32xf32>
    %c0_1 = arith.constant 0 : index
    %c0_2 = arith.constant 0 : index
    %1 = vector.load %arg2[%c0_1, %c0_2] : memref<32x128xf32, #tpu.memory_space<vmem>>, vector<32x128xf32>
    %cst = arith.constant dense<0.000000e+00> : vector<8x128xf32>
    %2 = tpu.matmul %0, %1, %cst {dimension_numbers = #tpu.dot_dimension_numbers<[1], [0], [0], [1], [0, 0, 1, 1], [], []>} : vector<8x32xf32>, vector<32x128xf32>, vector<8x128xf32> -> vector<8x128xf32>
    %c0_3 = arith.constant 0 : index
    %c0_4 = arith.constant 0 : index
    %3 = vector.load %arg3[%c0_3, %c0_4] : memref<1x128xf32, #tpu.memory_space<vmem>>, vector<1x128xf32>
    %4 = vector.broadcast %3 : vector<1x128xf32> to vector<8x128xf32>
    %5 = arith.addf %2, %4 : vector<8x128xf32>
    %cst_5 = arith.constant 0.000000e+00 : f32
    %6 = vector.broadcast %cst_5 : f32 to vector<8x128xf32>
    %7 = arith.maximumf %5, %6 : vector<8x128xf32>
    %8 = math.absf %5 : vector<8x128xf32>
    %cst_6 = arith.constant 0.000000e+00 : f32
    %9 = vector.broadcast %cst_6 : f32 to vector<8x128xf32>
    %10 = arith.subf %9, %8 : vector<8x128xf32>
    %11 = math.exp %10 : vector<8x128xf32>
    %cst_7 = arith.constant 1.000000e+00 : f32
    %12 = vector.broadcast %cst_7 : f32 to vector<8x128xf32>
    %13 = arith.addf %12, %11 : vector<8x128xf32>
    %14 = math.log %13 : vector<8x128xf32>
    %15 = arith.addf %7, %14 : vector<8x128xf32>
    %16 = tpu.iota {dimensions = array<i32: 1>} : vector<8x128xi32>
    %c64_i32 = arith.constant 64 : i32
    %17 = vector.broadcast %c64_i32 : i32 to vector<8x128xi32>
    %18 = arith.cmpi slt, %16, %17 : vector<8x128xi32>
    %19 = arith.select %18, %5, %15 : vector<8x128xi1>, vector<8x128xf32>
    %c0_8 = arith.constant 0 : index
    %c0_9 = arith.constant 0 : index
    %20 = vector.load %arg4[%c0_8, %c0_9] : memref<8x128xf32, #tpu.memory_space<vmem>>, vector<8x128xf32>
    tpu.vector_store %arg4[%c0_8, %c0_9], %19 {strides = array<i32>} : memref<8x128xf32, #tpu.memory_space<vmem>>, vector<8x128xf32>,
    return
  }
  func.func @transform_0(%arg0: i32) -> (i32, i32) {
    %c0_i32 = arith.constant 0 : i32
    %c0_i32_0 = arith.constant 0 : i32
    return %arg0, %c0_i32 : i32, i32
  }
  func.func @transform_1(%arg0: i32) -> (i32, i32) {
    %c0_i32 = arith.constant 0 : i32
    %c0_i32_0 = arith.constant 0 : i32
    %c0_i32_1 = arith.constant 0 : i32
    return %c0_i32, %c0_i32_0 : i32, i32
  }
  func.func @transform_2(%arg0: i32) -> (i32, i32) {
    %c0_i32 = arith.constant 0 : i32
    %c0_i32_0 = arith.constant 0 : i32
    %c0_i32_1 = arith.constant 0 : i32
    return %c0_i32, %c0_i32_0 : i32, i32
  }
  func.func @transform_3(%arg0: i32) -> (i32, i32) {
    %c0_i32 = arith.constant 0 : i32
    %c0_i32_0 = arith.constant 0 : i32
    return %arg0, %c0_i32 : i32, i32
  }
}

</mosaic_0001>

<bundles_post_ra>
// kernel: tpu_custom_call.1
= control target key start
LH: loop header
LB: loop body
LE: loop exit
PB: predicated region body
PF: predicated region fallthrough
CT: control target
= control target key end

     0   :  { %8 = vsyncpa [#allocation3], 0  ;;  %s291_s0 = inlined_call_operand.hbm [shape: f32[8,32], index: 0, kind: input, shape index: {}]   ;;  %s292_s1 = inlined_call_operand.hbm [shape: f32[32,128], index: 1, kind: input, shape index: {}]   ;;  %s293_s2 = inlined_call_operand.vmem [shape: f32[1,128], index: 2, kind: input, shape index: {}]   ;;  %s294_s3 = inlined_call_operand.hbm [shape: f32[8,128], index: 3, kind: output, shape index: {}]  }
   0x1   :  { %9 = vsyncpa [#allocation6], 0 }
   0x2   :  { %10 = vsyncpa [#allocation4], 0  ;;  %s252_s12 = smov [#allocation2]   ;;  %s253_s14 = smov [#allocation5]  }
   0x3   :  { %s17_s13 = sshll.u32 %s252_s12, 4  ;;  %s26_s15 = sshll.u32 %s253_s14, 4  ;;  %s18_s13 = int_to_ptr.vmem [resolvable:$true] %s17_s13  ;;  %s27_s15 = int_to_ptr.vmem [resolvable:$true] %s26_s15 }
   0x4   :  { %s194_s16 = scalar_lea.vmem %s18_s13, 128  ;;  %p199_p1 = scmp.lt.s32.totalorder %s18_s13, %s18_s13 }
   0x5   :  { %p195_p0 = scmp.ne.s32.totalorder %s18_s13, %s194_s16  ;;  %p200_p2 = scmp.lt.s32.totalorder %s194_s16, %s194_s16 }
   0x7   :  { %p201_p3 = por %p200_p2, %p199_p1 }
   0x9   :  { %p202_p4 = pnand %p201_p3, %p195_p0 }
   0xb   :  { %205 = shalt.err (!%p202_p4)
}
   0xc   :  { %20 = dma.hbm_to_vmem [thread:$0]  %s291_s0, 128, %s18_s13, [#allocation3]  }
   0xd   :  { %s214_s19 = scalar_lea.vmem %s27_s15, 512  ;;  %p219_p6 = scmp.lt.s32.totalorder %s27_s15, %s27_s15 }
   0xe   :  { %p215_p5 = scmp.ne.s32.totalorder %s27_s15, %s214_s19  ;;  %p220_p7 = scmp.lt.s32.totalorder %s214_s19, %s214_s19 }
  0x10   :  { %p221_p8 = por %p220_p7, %p219_p6 }
  0x12   :  { %p222_p9 = pnand %p221_p8, %p215_p5 }
  0x14   :  { %225 = shalt.err (!%p222_p9)
}
  0x15   :  { %s254_s20 = smov 128   ;;  %s255_s21 = smov 8  }
  0x16   :  { %32 = dma.hbm_to_vmem [thread:$0]  %s292_s1, 512, %s27_s15, [#allocation6], %s254_s20, %s254_s20, %s255_s21  }
  0x17   :  { %246 = dma.done.wait [#allocation3], 128  }
  0x18   :  { %247 = vsyncadd [#allocation3], 4294967168 }
  0x19   :  { %248 = dma.done.wait [#allocation6], 512  }
  0x1a   :  { %249 = vsyncadd [#allocation6], 4294966784  ;;  %v256_v0 = vmov 0.0   ;;  %vm257_vm0 = vmmov 0   ;;  %v45_v1 = vld [vmem:[#allocation5 + $0x18] sm:$0xff]  ;;  %v44_v2 = vld [vmem:[#allocation5 + $0x10] sm:$0xff]  ;;  %v136_v15 = vlaneseq }
  0x1b   :  { %164 = vmatprep.subr.mxu0 %v256_v0  ;;  %172 = vmatprep.mubr.msk.f32.mxu0 %vm257_vm0, %v256_v0  ;;  %v43_v3 = vld [vmem:[#allocation5 + $0x8] sm:$0xff]  ;;  %v42_v4 = vld [vmem:[#allocation5] sm:$0xff]  ;;  %v41_v5 = vld [vmem:[#allocation2] sm:$0xff]  ;;  %vm53_vm1 = vcmask 261120   ;;  %s258_s24 = smov [#allocation7]  }
  0x1c   :  { %165 = vmatpush3.msra.mxu0 %v45_v1  ;;  %v157_v6 = vld [vmem:[%s293_s2] ss:$0 sm:$0xff]  ;;  %v137_v16 = vand.u32 127, %v136_v15  ;;  %s147_s25 = sshll.u32 %s258_s24, 4  ;;  %s148_s25 = int_to_ptr.vmem [resolvable:$true] %s147_s25 }
  0x1d   :  { %166 = vmatprep.subr.mxu0 %v256_v0  ;;  %s226_s2 = scalar_lea.vmem %s148_s25, 128  ;;  %p231_p11 = scmp.lt.s32.totalorder %s148_s25, %s148_s25 }
  0x1e   :  { %167 = vmatpush3.msra.mxu0 %v44_v2  ;;  %vm138_vm2 = vcmp.lt.s32.totalorder %v137_v16, 64  ;;  %p227_p10 = scmp.ne.s32.totalorder %s148_s25, %s226_s2  ;;  %p232_p12 = scmp.lt.s32.totalorder %s226_s2, %s226_s2 }
  0x1f   :  { %168 = vmatprep.subr.mxu0 %v256_v0 }
  0x20   :  { %169 = vmatpush3.msra.mxu0 %v43_v3  ;;  %p233_p13 = por %p232_p12, %p231_p11 }
  0x21   :  { %170 = vmatprep.subr.mxu0 %v256_v0 }
  0x22   :  { %171 = vmatpush3.msra.mxu0 %v42_v4  ;;  %p234_p0 = pnand %p233_p13, %p227_p10 }
  0x23   :  { %173 = vmatmul.mubr.msk.f32.vlgmr.msra.gmra.mxu0 %vm53_vm1, %v41_v5 }
  0xe3   :  { %v123_v7 = vpop.f32.mrf.mxu0 }
  0xe4   :  { %v124_v8 = vadd.f32 %v157_v6, %v123_v7 }
  0xe5   :  { %v174_v9 = vpop.f32.mrf.mxu0 }
  0xe6   :  { %v128_v10 = vand.u32 2147483647, %v124_v8  ;;  %v127_v18 = vmax.f32 %v124_v8, 0.0 }
  0xe8   :  { %v129_v11 = vsub.f32 0.0, %v128_v10 }
  0xea   :  { %v130_v12 = vmul.f32 1.442695, %v129_v11 }
  0xec   :  { %182 = vpow2.f32 %v130_v12 }
  0xf9   :  { %v183_v13 = vpop.eup %182 }
  0xfa   :  { %v132_v14 = vadd.f32 1.0, %v183_v13 }
  0xfc   :  { %184 = vlog2.f32 %v132_v14 }
 0x109   :  { %v185_v17 = vpop.eup %184 }
 0x10a   :  { %v134_v19 = vmul.f32 0.6931472, %v185_v17 }
 0x10c   :  { %v135_v20 = vadd.f32 %v134_v19, %v127_v18 }
 0x10e   :  { %v139_v21 = vsel %vm138_vm2, %v124_v8, %v135_v20 }
 0x10f   :  { %140 = vst [vmem:[#allocation7] sm:$0xff] %v139_v21 }
 0x110   :  { %237 = shalt.err (!%p234_p0)
}
 0x111   :  { %150 = dma.vmem_to_hbm [thread:$0]  %s148_s25, 128, %s294_s3, [#allocation4]  }
 0x112   :  { %250 = dma.done.wait [#allocation4], 128  }
 0x113   :  { %251 = vsyncadd [#allocation4], 4294967168 }
 0x114   :  { %154 = vsyncpa [#allocation3], 1 }
 0x115   :  { %155 = vsyncpa [#allocation6], 1 }
 0x116   :  { %156 = vsyncpa [#allocation4], 1 }

</bundles_post_ra>
